<compile_context>
chip_gen: v5e
topology: v5e:2x2
jax: 0.10.0
libtpu: 0.0.40
codegen_flags: <defaults>
</compile_context>

<pallas_src>
import numpy as np

import jax
import jax.numpy as jnp
from jax.experimental import pallas as pl
from jax.experimental.pallas import tpu as pltpu


_MIN_PALLAS_ELEMS = 8192               # below this, XLA broadcast_to is cheaper than a pallas_call
_TARGET_TILE_BYTES = 2 * 1024 * 1024   # ~2 MiB output tiles: safe for v5e/v6e/v7x default VMEM limits


def _bcast_kernel(x_ref, o_ref):
    # Pure copy/broadcast of the (possibly size-1) input block to the output block.
    o_ref[...] = jnp.broadcast_to(x_ref[...], o_ref.shape)


def _fold_dims(in_shape, out_shape):
    """Merge adjacent dims with the same broadcast class ('kept' vs 'broadcast').

    `in_shape` must already be rank-aligned to `out_shape` (1s prepended).
    Returns (folded_in_shape, folded_out_shape), both of rank >= 2.
    """
    rank = len(out_shape)
    groups = []  # list of [cls, [dims]] with cls in {'k', 'b', None}
    for d in range(rank):
        o_d, i_d = out_shape[d], in_shape[d]
        if o_d == 1:
            cls = None      # wildcard, merges with anything
        elif i_d == 1:
            cls = 'b'       # broadcast dim
        else:
            cls = 'k'       # kept dim (i_d == o_d)
        if groups and (cls is None or groups[-1][0] is None or groups[-1][0] == cls):
            if groups[-1][0] is None:
                groups[-1][0] = cls
            groups[-1][1].append(d)
        else:
            groups.append([cls, [d]])

    out_f = [int(np.prod([out_shape[d] for d in dims], dtype=np.int64)) for _, dims in groups]
    in_f = [int(np.prod([in_shape[d] for d in dims], dtype=np.int64)) for _, dims in groups]
    while len(out_f) < 2:               # keep at least 2-D for TPU tiling
        out_f.insert(0, 1)
        in_f.insert(0, 1)
    return tuple(in_f), tuple(out_f)


def _choose_blocks(out_f, itemsize, target_bytes):
    """Pick an output block shape targeting ~target_bytes lane-dense tiles."""
    rank = len(out_f)
    target_elems = max(1, target_bytes // itemsize)
    blk = [1] * rank

    # Lane (last) dim: keep full if it fits or is narrow; otherwise a multiple of 128.
    L = out_f[-1]
    if L <= target_elems or L <= 128:
        blk[-1] = L
    else:
        b = (target_elems // 128) * 128
        blk[-1] = max(128, min(b, (L // 128) * 128))
    budget = max(1, target_elems // blk[-1])

    # Sublane (second-to-last) dim: respect dtype packing (8 f32 / 16 bf16 / 32 int8).
    sub_mult = 8 * max(1, 4 // itemsize)
    S = out_f[-2]
    if S <= budget or S <= sub_mult:
        blk[-2] = S
    else:
        blk[-2] = max(sub_mult, (budget // sub_mult) * sub_mult)
    budget = max(1, budget // blk[-2])

    # Leading dims (innermost first): no divisibility constraint.
    for d in range(rank - 3, -1, -1):
        blk[d] = min(out_f[d], budget)
        budget = max(1, budget // blk[d])
    return tuple(blk)


def _broadcast_one(x, out_shape, *, min_pallas_elems=_MIN_PALLAS_ELEMS,
                   target_tile_bytes=_TARGET_TILE_BYTES):
    out_shape = tuple(int(d) for d in out_shape)

    # 1) Already at the broadcast shape: no data movement at all.
    if tuple(x.shape) == out_shape:
        return x

    # 2) Tiny (or empty) outputs: per-pallas_call overhead dwarfs the copy.
    total = int(np.prod(out_shape, dtype=np.int64)) if out_shape else 1
    if total <= min_pallas_elems:
        return jnp.broadcast_to(x, out_shape)

    # 3) Pallas copy path on the folded (lane-dense) problem.
    rank = len(out_shape)
    in_aligned = (1,) * (rank - x.ndim) + tuple(int(d) for d in x.shape)
    in_f, out_f = _fold_dims(in_aligned, out_shape)
    x_f = x.reshape(in_f)

    itemsize = int(np.dtype(x.dtype).itemsize)
    blk_out = _choose_blocks(out_f, itemsize, target_tile_bytes)
    nfd = len(out_f)
    blk_in = tuple(1 if in_f[d] == 1 else blk_out[d] for d in range(nfd))
    grid = tuple(pl.cdiv(out_f[d], blk_out[d]) for d in range(nfd))
    bcast = tuple(in_f[d] == 1 for d in range(nfd))

    def in_index(*gi, _b=bcast):
        # Broadcast dims always read block 0 (constant index => single fetch,
        # the block stays resident in VMEM across consecutive grid steps).
        return tuple(0 if _b[d] else gi[d] for d in range(len(_b)))

    def out_index(*gi):
        return tuple(gi)

    y = pl.pallas_call(
        _bcast_kernel,
        grid=grid,
        in_specs=[pl.BlockSpec(blk_in, in_index)],
        out_specs=pl.BlockSpec(blk_out, out_index),
        out_shape=jax.ShapeDtypeStruct(out_f, x.dtype),
        compiler_params=pltpu.CompilerParams(
            dimension_semantics=("parallel",) * len(grid)),
    )(x_f)
    return y.reshape(out_shape)


def broadcast_tensors(tensors, *, min_pallas_elems=_MIN_PALLAS_ELEMS,
                      target_tile_bytes=_TARGET_TILE_BYTES):
    """JAX/Pallas equivalent of torch._VF.broadcast_tensors(list_of_tensors)."""
    tensors = [jnp.asarray(t) for t in tensors]
    out_shape = jnp.broadcast_shapes(*[t.shape for t in tensors])
    return tuple(
        _broadcast_one(t, out_shape,
                       min_pallas_elems=min_pallas_elems,
                       target_tile_bytes=target_tile_bytes)
        for t in tensors)


if __name__ == "__main__":
    key = jax.random.PRNGKey(0)
    k1, k2, k3 = jax.random.split(key, 3)

    def check(inputs, **kw):
        outs = jax.block_until_ready(broadcast_tensors(inputs, **kw))
        tgt = jnp.broadcast_shapes(*[t.shape for t in inputs])
        for inp, out in zip(inputs, outs):
            ref = jnp.broadcast_to(inp, tgt)
            assert out.shape == tuple(tgt), (out.shape, tgt)
            assert out.dtype == inp.dtype, (out.dtype, inp.dtype)
            np.testing.assert_array_equal(np.asarray(out), np.asarray(ref))

    # Case 1: mirrors the module's example x = torch.arange(3).view(1, 3, 1)
    # (tiny total -> XLA fallback path, no pallas_call launched).
    x0 = jnp.arange(3, dtype=jnp.int32).reshape(1, 3, 1)
    x1 = jax.random.normal(k1, (2, 1, 4), dtype=jnp.float32)
    x2 = jax.random.normal(k2, (4,), dtype=jnp.float32)
    check([x0, x1, x2])

    # Case 2: larger inputs exercising the Pallas copy path with default tiling.
    a = jax.random.normal(k1, (8, 1, 256), dtype=jnp.float32)
    b = jax.random.normal(k2, (1, 64, 256), dtype=jnp.float32)
    c = jax.random.normal(k3, (8, 64, 256), dtype=jnp.float32)   # already full shape -> short-circuit
    d = jnp.arange(256, dtype=jnp.int32)
    e = jnp.arange(64, dtype=jnp.bfloat16).reshape(1, 64, 1)
    check([a, b, c, d, e])

    # Case 3: same inputs with tiny tiles to force multi-step grids through the
    # blocked index maps (covers blocked sublane/lane tails and leading dims).
    check([a, b, c, d, e], min_pallas_elems=0, target_tile_bytes=64 * 1024)

    print("KERNEL_OK")
</pallas_src>

<mosaic_0001>
module attributes {stable_mosaic.version = 11 : i64} {
  func.func @_bcast_kernel(%arg0: i32, %arg1: i32, %arg2: i32, %arg3: memref<8x1x256xf32, #tpu.memory_space<vmem>>, %arg4: memref<8x64x256xf32, #tpu.memory_space<vmem>>) attributes {dimension_semantics = [#tpu.dimension_semantics<parallel>, #tpu.dimension_semantics<parallel>, #tpu.dimension_semantics<parallel>], iteration_bounds = array<i64: 1, 1, 1>, scalar_prefetch = 0 : i64, scratch_operands = 0 : i64, tpu.core_type = #tpu.core_type<tc>, window_params = [{transform_indices = @transform_0, window_bounds = array<i64: 8, 1, 256>}, {transform_indices = @transform_1, window_bounds = array<i64: 8, 64, 256>}]} {
    %c0 = arith.constant 0 : index
    %c0_0 = arith.constant 0 : index
    %c0_1 = arith.constant 0 : index
    %0 = vector.load %arg3[%c0, %c0_0, %c0_1] : memref<8x1x256xf32, #tpu.memory_space<vmem>>, vector<8x1x256xf32>
    %1 = vector.shape_cast %0 : vector<8x1x256xf32> to vector<8x1x256xf32>
    %2 = vector.broadcast %1 : vector<8x1x256xf32> to vector<8x64x256xf32>
    %c0_2 = arith.constant 0 : index
    %c0_3 = arith.constant 0 : index
    %c0_4 = arith.constant 0 : index
    %3 = vector.load %arg4[%c0_2, %c0_3, %c0_4] : memref<8x64x256xf32, #tpu.memory_space<vmem>>, vector<8x64x256xf32>
    tpu.vector_store %arg4[%c0_2, %c0_3, %c0_4], %2 {strides = array<i32>} : memref<8x64x256xf32, #tpu.memory_space<vmem>>, vector<8x64x256xf32>,
    return
  }
  func.func @transform_0(%arg0: i32, %arg1: i32, %arg2: i32) -> (i32, i32, i32) {
    %c0_i32 = arith.constant 0 : i32
    %c0_i32_0 = arith.constant 0 : i32
    return %arg0, %c0_i32, %arg2 : i32, i32, i32
  }
  func.func @transform_1(%arg0: i32, %arg1: i32, %arg2: i32) -> (i32, i32, i32) {
    %c0_i32 = arith.constant 0 : i32
    return %arg0, %arg1, %arg2 : i32, i32, i32
  }
}

</mosaic_0001>

<bundles_post_ra>
// kernel: tpu_custom_call.1
= control target key start
LH: loop header
LB: loop body
LE: loop exit
PB: predicated region body
PF: predicated region fallthrough
CT: control target
= control target key end

     0   :  { %6 = vsyncpa [#allocation3], 0  ;;  %s300_s0 = inlined_call_operand.hbm [shape: f32[8,1,256], index: 0, kind: input, shape index: {}]   ;;  %s301_s1 = inlined_call_operand.hbm [shape: f32[8,64,256], index: 1, kind: output, shape index: {}]  }
   0x1   :  { %7 = vsyncpa [#allocation4], 0  ;;  %s12_s8 = sshll.u32 %s300_s0, 4  ;;  %s278_s9 = smov [#allocation2]   ;;  %s13_s8 = int_to_ptr.hbm [resolvable:$true] %s12_s8 }
   0x2   :  { %s14_s10 = sshll.u32 %s278_s9, 4  ;;  %s279_s11 = smov 32   ;;  %s15_s10 = int_to_ptr.vmem [resolvable:$true] %s14_s10 }
   0x3   :  { %s280_s12 = smov 2  }
   0x4   :  { %20 = dma.hbm_to_vmem [thread:$0]  %s13_s8, 256, %s15_s10, [#allocation3], %s279_s11, %s279_s11, %s280_s12  }
   0x5   :  { %274 = dma.done.wait [#allocation3], 256  }
   0x6   :  { %275 = vsyncadd [#allocation3], 4294967040  ;;  %v25_v0 = vld [vmem:[#allocation2] sm:$0x3]  ;;  %v26_v3 = vld [vmem:[#allocation2 + $0x2] sm:$0x3] }
   0x7   :  { %v41_v1 = vperm.slane %v25_v0, 0  ;;  %v42_v2 = vperm.slane %v25_v0, 1  ;;  %v43_v4 = vperm.slane %v26_v3, 0  ;;  %v44_v5 = vperm.slane %v26_v3, 1  ;;  %v27_v6 = vld [vmem:[#allocation2 + $0x4] sm:$0x3] }
   0x8   :  { %v45_v7 = vperm.slane %v27_v6, 0  ;;  %v46_v8 = vperm.slane %v27_v6, 1  ;;  %v28_v9 = vld [vmem:[#allocation2 + $0x6] sm:$0x3]  ;;  %v29_v12 = vld [vmem:[#allocation2 + $0x8] sm:$0x3] }
   0x9   :  { %73 = vst [vmem:[#allocation5] sm:$0xff] %v41_v1  ;;  %v47_v10 = vperm.slane %v28_v9, 0  ;;  %v48_v11 = vperm.slane %v28_v9, 1  ;;  %v49_v13 = vperm.slane %v29_v12, 0  ;;  %v50_v14 = vperm.slane %v29_v12, 1  ;;  %s281_s0 = smov [#allocation5]  }
   0xa   :  { %75 = vst [vmem:[#allocation5 + $0x10] sm:$0xff] %v41_v1  ;;  %v30_v15 = vld [vmem:[#allocation2 + $0xa] sm:$0x3]  ;;  %v31_v18 = vld [vmem:[#allocation2 + $0xc] sm:$0x3]  ;;  %s205_s13 = sshll.u32 %s281_s0, 4  ;;  %s206_s13 = int_to_ptr.vmem [resolvable:$true] %s205_s13 }
   0xb   :  { %77 = vst [vmem:[#allocation5 + $0x20] sm:$0xff] %v41_v1  ;;  %v51_v16 = vperm.slane %v30_v15, 0  ;;  %v52_v17 = vperm.slane %v30_v15, 1  ;;  %v53_v19 = vperm.slane %v31_v18, 0  ;;  %v54_v20 = vperm.slane %v31_v18, 1  ;;  %s207_s16 = sshll.u32 %s301_s1, 4  ;;  %s208_s16 = int_to_ptr.hbm [resolvable:$true] %s207_s16 }
   0xc   :  { %79 = vst [vmem:[#allocation5 + $0x30] sm:$0xff] %v41_v1  ;;  %v32_v21 = vld [vmem:[#allocation2 + $0xe] sm:$0x3]  ;;  %s282_s17 = smov 256   ;;  %s283_s18 = smov 16  }
   0xd   :  { %81 = vst [vmem:[#allocation5 + $0x40] sm:$0xff] %v41_v1  ;;  %v55_v22 = vperm.slane %v32_v21, 0  ;;  %v56_v23 = vperm.slane %v32_v21, 1 }
   0xe   :  { %83 = vst [vmem:[#allocation5 + $0x50] sm:$0xff] %v41_v1 }
   0xf   :  { %85 = vst [vmem:[#allocation5 + $0x60] sm:$0xff] %v41_v1 }
  0x10   :  { %87 = vst [vmem:[#allocation5 + $0x70] sm:$0xff] %v41_v1 }
  0x11   :  { %74 = vst [vmem:[#allocation5 + $0x8] sm:$0xff] %v42_v2 }
  0x12   :  { %76 = vst [vmem:[#allocation5 + $0x18] sm:$0xff] %v42_v2 }
  0x13   :  { %78 = vst [vmem:[#allocation5 + $0x28] sm:$0xff] %v42_v2 }
  0x14   :  { %80 = vst [vmem:[#allocation5 + $0x38] sm:$0xff] %v42_v2 }
  0x15   :  { %82 = vst [vmem:[#allocation5 + $0x48] sm:$0xff] %v42_v2 }
  0x16   :  { %84 = vst [vmem:[#allocation5 + $0x58] sm:$0xff] %v42_v2 }
  0x17   :  { %86 = vst [vmem:[#allocation5 + $0x68] sm:$0xff] %v42_v2 }
  0x18   :  { %88 = vst [vmem:[#allocation5 + $0x78] sm:$0xff] %v42_v2 }
  0x19   :  { %89 = vst [vmem:[#allocation5 + $0x80] sm:$0xff] %v43_v4 }
  0x1a   :  { %91 = vst [vmem:[#allocation5 + $0x90] sm:$0xff] %v43_v4 }
  0x1b   :  { %93 = vst [vmem:[#allocation5 + $0xa0] sm:$0xff] %v43_v4 }
  0x1c   :  { %95 = vst [vmem:[#allocation5 + $0xb0] sm:$0xff] %v43_v4 }
  0x1d   :  { %97 = vst [vmem:[#allocation5 + $0xc0] sm:$0xff] %v43_v4 }
  0x1e   :  { %99 = vst [vmem:[#allocation5 + $0xd0] sm:$0xff] %v43_v4 }
  0x1f   :  { %101 = vst [vmem:[#allocation5 + $0xe0] sm:$0xff] %v43_v4 }
  0x20   :  { %103 = vst [vmem:[#allocation5 + $0xf0] sm:$0xff] %v43_v4 }
  0x21   :  { %90 = vst [vmem:[#allocation5 + $0x88] sm:$0xff] %v44_v5 }
  0x22   :  { %92 = vst [vmem:[#allocation5 + $0x98] sm:$0xff] %v44_v5 }
  0x23   :  { %94 = vst [vmem:[#allocation5 + $0xa8] sm:$0xff] %v44_v5 }
  0x24   :  { %96 = vst [vmem:[#allocation5 + $0xb8] sm:$0xff] %v44_v5 }
  0x25   :  { %98 = vst [vmem:[#allocation5 + $0xc8] sm:$0xff] %v44_v5 }
  0x26   :  { %100 = vst [vmem:[#allocation5 + $0xd8] sm:$0xff] %v44_v5 }
  0x27   :  { %102 = vst [vmem:[#allocation5 + $0xe8] sm:$0xff] %v44_v5 }
  0x28   :  { %104 = vst [vmem:[#allocation5 + $0xf8] sm:$0xff] %v44_v5 }
  0x29   :  { %105 = vst [vmem:[#allocation5 + $0x100] sm:$0xff] %v45_v7 }
  0x2a   :  { %107 = vst [vmem:[#allocation5 + $0x110] sm:$0xff] %v45_v7 }
  0x2b   :  { %109 = vst [vmem:[#allocation5 + $0x120] sm:$0xff] %v45_v7 }
  0x2c   :  { %111 = vst [vmem:[#allocation5 + $0x130] sm:$0xff] %v45_v7 }
  0x2d   :  { %113 = vst [vmem:[#allocation5 + $0x140] sm:$0xff] %v45_v7 }
  0x2e   :  { %115 = vst [vmem:[#allocation5 + $0x150] sm:$0xff] %v45_v7 }
  0x2f   :  { %117 = vst [vmem:[#allocation5 + $0x160] sm:$0xff] %v45_v7 }
  0x30   :  { %119 = vst [vmem:[#allocation5 + $0x170] sm:$0xff] %v45_v7 }
  0x31   :  { %106 = vst [vmem:[#allocation5 + $0x108] sm:$0xff] %v46_v8 }
  0x32   :  { %108 = vst [vmem:[#allocation5 + $0x118] sm:$0xff] %v46_v8 }
  0x33   :  { %110 = vst [vmem:[#allocation5 + $0x128] sm:$0xff] %v46_v8 }
  0x34   :  { %112 = vst [vmem:[#allocation5 + $0x138] sm:$0xff] %v46_v8 }
  0x35   :  { %114 = vst [vmem:[#allocation5 + $0x148] sm:$0xff] %v46_v8 }
  0x36   :  { %116 = vst [vmem:[#allocation5 + $0x158] sm:$0xff] %v46_v8 }
  0x37   :  { %118 = vst [vmem:[#allocation5 + $0x168] sm:$0xff] %v46_v8 }
  0x38   :  { %120 = vst [vmem:[#allocation5 + $0x178] sm:$0xff] %v46_v8 }
  0x39   :  { %121 = vst [vmem:[#allocation5 + $0x180] sm:$0xff] %v47_v10 }
  0x3a   :  { %123 = vst [vmem:[#allocation5 + $0x190] sm:$0xff] %v47_v10 }
  0x3b   :  { %125 = vst [vmem:[#allocation5 + $0x1a0] sm:$0xff] %v47_v10 }
  0x3c   :  { %127 = vst [vmem:[#allocation5 + $0x1b0] sm:$0xff] %v47_v10 }
  0x3d   :  { %129 = vst [vmem:[#allocation5 + $0x1c0] sm:$0xff] %v47_v10 }
  0x3e   :  { %131 = vst [vmem:[#allocation5 + $0x1d0] sm:$0xff] %v47_v10 }
  0x3f   :  { %133 = vst [vmem:[#allocation5 + $0x1e0] sm:$0xff] %v47_v10 }
  0x40   :  { %135 = vst [vmem:[#allocation5 + $0x1f0] sm:$0xff] %v47_v10 }
  0x41   :  { %122 = vst [vmem:[#allocation5 + $0x188] sm:$0xff] %v48_v11 }
  0x42   :  { %124 = vst [vmem:[#allocation5 + $0x198] sm:$0xff] %v48_v11 }
  0x43   :  { %126 = vst [vmem:[#allocation5 + $0x1a8] sm:$0xff] %v48_v11 }
  0x44   :  { %128 = vst [vmem:[#allocation5 + $0x1b8] sm:$0xff] %v48_v11 }
  0x45   :  { %130 = vst [vmem:[#allocation5 + $0x1c8] sm:$0xff] %v48_v11 }
  0x46   :  { %132 = vst [vmem:[#allocation5 + $0x1d8] sm:$0xff] %v48_v11 }
  0x47   :  { %134 = vst [vmem:[#allocation5 + $0x1e8] sm:$0xff] %v48_v11 }
  0x48   :  { %136 = vst [vmem:[#allocation5 + $0x1f8] sm:$0xff] %v48_v11 }
  0x49   :  { %137 = vst [vmem:[#allocation5 + $0x200] sm:$0xff] %v49_v13 }
  0x4a   :  { %139 = vst [vmem:[#allocation5 + $0x210] sm:$0xff] %v49_v13 }
  0x4b   :  { %141 = vst [vmem:[#allocation5 + $0x220] sm:$0xff] %v49_v13 }
  0x4c   :  { %143 = vst [vmem:[#allocation5 + $0x230] sm:$0xff] %v49_v13 }
  0x4d   :  { %145 = vst [vmem:[#allocation5 + $0x240] sm:$0xff] %v49_v13 }
  0x4e   :  { %147 = vst [vmem:[#allocation5 + $0x250] sm:$0xff] %v49_v13 }
  0x4f   :  { %149 = vst [vmem:[#allocation5 + $0x260] sm:$0xff] %v49_v13 }
  0x50   :  { %151 = vst [vmem:[#allocation5 + $0x270] sm:$0xff] %v49_v13 }
  0x51   :  { %138 = vst [vmem:[#allocation5 + $0x208] sm:$0xff] %v50_v14 }
  0x52   :  { %140 = vst [vmem:[#allocation5 + $0x218] sm:$0xff] %v50_v14 }
  0x53   :  { %142 = vst [vmem:[#allocation5 + $0x228] sm:$0xff] %v50_v14 }
  0x54   :  { %144 = vst [vmem:[#allocation5 + $0x238] sm:$0xff] %v50_v14 }
  0x55   :  { %146 = vst [vmem:[#allocation5 + $0x248] sm:$0xff] %v50_v14 }
  0x56   :  { %148 = vst [vmem:[#allocation5 + $0x258] sm:$0xff] %v50_v14 }
  0x57   :  { %150 = vst [vmem:[#allocation5 + $0x268] sm:$0xff] %v50_v14 }
  0x58   :  { %152 = vst [vmem:[#allocation5 + $0x278] sm:$0xff] %v50_v14 }
  0x59   :  { %153 = vst [vmem:[#allocation5 + $0x280] sm:$0xff] %v51_v16 }
  0x5a   :  { %155 = vst [vmem:[#allocation5 + $0x290] sm:$0xff] %v51_v16 }
  0x5b   :  { %157 = vst [vmem:[#allocation5 + $0x2a0] sm:$0xff] %v51_v16 }
  0x5c   :  { %159 = vst [vmem:[#allocation5 + $0x2b0] sm:$0xff] %v51_v16 }
  0x5d   :  { %161 = vst [vmem:[#allocation5 + $0x2c0] sm:$0xff] %v51_v16 }
  0x5e   :  { %163 = vst [vmem:[#allocation5 + $0x2d0] sm:$0xff] %v51_v16 }
  0x5f   :  { %165 = vst [vmem:[#allocation5 + $0x2e0] sm:$0xff] %v51_v16 }
  0x60   :  { %167 = vst [vmem:[#allocation5 + $0x2f0] sm:$0xff] %v51_v16 }
  0x61   :  { %154 = vst [vmem:[#allocation5 + $0x288] sm:$0xff] %v52_v17 }
  0x62   :  { %156 = vst [vmem:[#allocation5 + $0x298] sm:$0xff] %v52_v17 }
  0x63   :  { %158 = vst [vmem:[#allocation5 + $0x2a8] sm:$0xff] %v52_v17 }
  0x64   :  { %160 = vst [vmem:[#allocation5 + $0x2b8] sm:$0xff] %v52_v17 }
  0x65   :  { %162 = vst [vmem:[#allocation5 + $0x2c8] sm:$0xff] %v52_v17 }
  0x66   :  { %164 = vst [vmem:[#allocation5 + $0x2d8] sm:$0xff] %v52_v17 }
  0x67   :  { %166 = vst [vmem:[#allocation5 + $0x2e8] sm:$0xff] %v52_v17 }
  0x68   :  { %168 = vst [vmem:[#allocation5 + $0x2f8] sm:$0xff] %v52_v17 }
  0x69   :  { %169 = vst [vmem:[#allocation5 + $0x300] sm:$0xff] %v53_v19 }
  0x6a   :  { %171 = vst [vmem:[#allocation5 + $0x310] sm:$0xff] %v53_v19 }
  0x6b   :  { %173 = vst [vmem:[#allocation5 + $0x320] sm:$0xff] %v53_v19 }
  0x6c   :  { %175 = vst [vmem:[#allocation5 + $0x330] sm:$0xff] %v53_v19 }
  0x6d   :  { %177 = vst [vmem:[#allocation5 + $0x340] sm:$0xff] %v53_v19 }
  0x6e   :  { %179 = vst [vmem:[#allocation5 + $0x350] sm:$0xff] %v53_v19 }
  0x6f   :  { %181 = vst [vmem:[#allocation5 + $0x360] sm:$0xff] %v53_v19 }
  0x70   :  { %183 = vst [vmem:[#allocation5 + $0x370] sm:$0xff] %v53_v19 }
  0x71   :  { %170 = vst [vmem:[#allocation5 + $0x308] sm:$0xff] %v54_v20 }
  0x72   :  { %172 = vst [vmem:[#allocation5 + $0x318] sm:$0xff] %v54_v20 }
  0x73   :  { %174 = vst [vmem:[#allocation5 + $0x328] sm:$0xff] %v54_v20 }
  0x74   :  { %176 = vst [vmem:[#allocation5 + $0x338] sm:$0xff] %v54_v20 }
  0x75   :  { %178 = vst [vmem:[#allocation5 + $0x348] sm:$0xff] %v54_v20 }
  0x76   :  { %180 = vst [vmem:[#allocation5 + $0x358] sm:$0xff] %v54_v20 }
  0x77   :  { %182 = vst [vmem:[#allocation5 + $0x368] sm:$0xff] %v54_v20 }
  0x78   :  { %184 = vst [vmem:[#allocation5 + $0x378] sm:$0xff] %v54_v20 }
  0x79   :  { %185 = vst [vmem:[#allocation5 + $0x380] sm:$0xff] %v55_v22 }
  0x7a   :  { %187 = vst [vmem:[#allocation5 + $0x390] sm:$0xff] %v55_v22 }
  0x7b   :  { %189 = vst [vmem:[#allocation5 + $0x3a0] sm:$0xff] %v55_v22 }
  0x7c   :  { %191 = vst [vmem:[#allocation5 + $0x3b0] sm:$0xff] %v55_v22 }
  0x7d   :  { %193 = vst [vmem:[#allocation5 + $0x3c0] sm:$0xff] %v55_v22 }
  0x7e   :  { %195 = vst [vmem:[#allocation5 + $0x3d0] sm:$0xff] %v55_v22 }
  0x7f   :  { %197 = vst [vmem:[#allocation5 + $0x3e0] sm:$0xff] %v55_v22 }
  0x80   :  { %199 = vst [vmem:[#allocation5 + $0x3f0] sm:$0xff] %v55_v22 }
  0x81   :  { %186 = vst [vmem:[#allocation5 + $0x388] sm:$0xff] %v56_v23 }
  0x82   :  { %188 = vst [vmem:[#allocation5 + $0x398] sm:$0xff] %v56_v23 }
  0x83   :  { %190 = vst [vmem:[#allocation5 + $0x3a8] sm:$0xff] %v56_v23 }
  0x84   :  { %192 = vst [vmem:[#allocation5 + $0x3b8] sm:$0xff] %v56_v23 }
  0x85   :  { %194 = vst [vmem:[#allocation5 + $0x3c8] sm:$0xff] %v56_v23 }
  0x86   :  { %196 = vst [vmem:[#allocation5 + $0x3d8] sm:$0xff] %v56_v23 }
  0x87   :  { %198 = vst [vmem:[#allocation5 + $0x3e8] sm:$0xff] %v56_v23 }
  0x88   :  { %200 = vst [vmem:[#allocation5 + $0x3f8] sm:$0xff] %v56_v23 }
  0x89   :  { %213 = dma.vmem_to_hbm [thread:$0]  %s206_s13, 16384, %s208_s16, [#allocation4], %s282_s17, %s282_s17, %s283_s18  }
  0x8a   :  { %276 = dma.done.wait [#allocation4], 16384  }
  0x8b   :  { %277 = vsyncadd [#allocation4], 4294950912 }
  0x8c   :  { %218 = vsyncpa [#allocation3], 1 }
  0x8d   :  { %219 = vsyncpa [#allocation4], 1 }

</bundles_post_ra>
